<compile_context>
chip_gen: v7x
topology: tpu7x:2x2x1
jax: 0.10.0
libtpu: 0.0.40
codegen_flags: <defaults>
</compile_context>

<pallas_src>
import jax
import jax.numpy as jnp
from jax.experimental import pallas as pl
from jax.experimental.pallas import tpu as pltpu


# --------------------------------------------------------------------------
# Kernels
# --------------------------------------------------------------------------
def linear_kernel(x_ref, w_ref, b_ref, y_ref, z_ref):
    """Packed per-node linears:
       [y | z] = x @ [Wagg^T | Wupd^T] + [0 | b_agg + b_upd]
       y -> bf16 (feeds the bf16 MXU matmul downstream), z -> f32."""
    yz = jnp.dot(x_ref[...], w_ref[...],
                 preferred_element_type=jnp.float32) + b_ref[...]
    d = y_ref.shape[-1]                       # 128-lane-aligned split point
    y_ref[...] = yz[:, :d].astype(y_ref.dtype)
    z_ref[...] = yz[:, d:]


def aggregate_kernel(adj_ref, y_ref, z_ref, o_ref, acc_ref):
    """out = adj @ y + z, tiled over (row-block i, reduction-block k).

    adj and y are bf16 (adj is exact 0/1); the matmul accumulates in f32 via
    preferred_element_type.  z is folded into the accumulator at k == 0 so
    finalize is a plain cast/store."""
    k = pl.program_id(1)

    @pl.when(k == 0)
    def _init():
        acc_ref[...] = z_ref[...]             # z replaces the zeros init

    acc_ref[...] += jnp.dot(adj_ref[...], y_ref[...],
                            preferred_element_type=jnp.float32)

    @pl.when(k == pl.num_programs(1) - 1)
    def _finalize():
        o_ref[...] = acc_ref[...].astype(o_ref.dtype)


# --------------------------------------------------------------------------
# Wrapper
# --------------------------------------------------------------------------
def _round_up(a, b):
    return ((a + b - 1) // b) * b


def _pick_tile(n_pad, preferred):
    for t in preferred:
        if t <= n_pad and n_pad % t == 0:
            return t
    return n_pad


def message_passing(x, edge_index, w_agg, b_agg, w_upd, b_upd):
    """x: (N, D_in) f32, edge_index: (2, E) int,
       w_*: (D_out, D_in) (PyTorch nn.Linear layout), b_*: (D_out,)."""
    n, d_in = x.shape
    d_out = w_agg.shape[0]

    n_pad = _round_up(max(n, 8), 256)
    d_in_pad = _round_up(d_in, 128)
    d_out_pad = _round_up(d_out, 128)

    # Row tile: large for bandwidth, but keep >= 2 row blocks so the
    # "parallel" row axis can split across both TensorCores on v7x.
    if n_pad % 512 == 0 and n_pad // 512 >= 2:
        tm = 512
    elif n_pad // 256 >= 2:
        tm = 256
    else:
        tm = 128
    # Reduction tile: as large as cleanly divides (adj is the hot stream).
    tk = _pick_tile(n_pad, (2048, 1024, 512, 256, 128))
    ni, nk = n_pad // tm, n_pad // tk

    # --- glue: dense symmetric adjacency (indexed scatter), stored in bf16 --
    adj = jnp.zeros((n_pad, n_pad), dtype=jnp.bfloat16)
    adj = adj.at[edge_index[0], edge_index[1]].set(1.0)
    adj = adj.at[edge_index[1], edge_index[0]].set(1.0)

    # --- pad operands to lane-aligned shapes --------------------------------
    x_pad = jnp.zeros((n_pad, d_in_pad), jnp.float32)
    x_pad = x_pad.at[:n, :d_in].set(jnp.asarray(x, jnp.float32))

    # Packed weights [Wagg^T | Wupd^T] and packed bias [0 | b_agg + b_upd].
    w_pack = jnp.zeros((d_in_pad, 2 * d_out_pad), jnp.float32)
    w_pack = w_pack.at[:d_in, :d_out].set(jnp.asarray(w_agg, jnp.float32).T)
    w_pack = w_pack.at[:d_in, d_out_pad:d_out_pad + d_out].set(
        jnp.asarray(w_upd, jnp.float32).T)
    b_pack = jnp.zeros((1, 2 * d_out_pad), jnp.float32)
    b_pack = b_pack.at[0, d_out_pad:d_out_pad + d_out].set(
        jnp.asarray(b_agg, jnp.float32) + jnp.asarray(b_upd, jnp.float32))

    vmem_limit = 32 * 1024 * 1024  # safe on v5e/v6e/v7x; tiles use << this

    # --- kernel 1: packed per-node linears -----------------------------------
    y, z = pl.pallas_call(
        linear_kernel,
        out_shape=(jax.ShapeDtypeStruct((n_pad, d_out_pad), jnp.bfloat16),
                   jax.ShapeDtypeStruct((n_pad, d_out_pad), jnp.float32)),
        grid=(ni,),
        in_specs=[
            pl.BlockSpec((tm, d_in_pad), lambda i: (i, 0)),              # x
            pl.BlockSpec((d_in_pad, 2 * d_out_pad), lambda i: (0, 0)),   # W
            pl.BlockSpec((1, 2 * d_out_pad), lambda i: (0, 0)),          # b
        ],
        out_specs=(pl.BlockSpec((tm, d_out_pad), lambda i: (i, 0)),      # y
                   pl.BlockSpec((tm, d_out_pad), lambda i: (i, 0))),     # z
        compiler_params=pltpu.CompilerParams(
            dimension_semantics=("parallel",),
            vmem_limit_bytes=vmem_limit),
    )(x_pad, w_pack, b_pack)

    # --- kernel 2: out = adj @ y + z, bf16 MXU + f32 accumulator -------------
    out_pad = pl.pallas_call(
        aggregate_kernel,
        out_shape=jax.ShapeDtypeStruct((n_pad, d_out_pad), jnp.float32),
        grid=(ni, nk),
        in_specs=[
            pl.BlockSpec((tm, tk), lambda i, k: (i, k)),             # adj tile
            pl.BlockSpec((tk, d_out_pad), lambda i, k: (k, 0)),      # y tile
            pl.BlockSpec((tm, d_out_pad), lambda i, k: (i, 0)),      # z tile
        ],
        out_specs=pl.BlockSpec((tm, d_out_pad), lambda i, k: (i, 0)),
        scratch_shapes=[pltpu.VMEM((tm, d_out_pad), jnp.float32)],
        compiler_params=pltpu.CompilerParams(
            dimension_semantics=("parallel", "arbitrary"),
            vmem_limit_bytes=vmem_limit),
    )(adj, y, z)

    return out_pad[:n, :d_out]


# --------------------------------------------------------------------------
# Reference + demo
# --------------------------------------------------------------------------
def _init_linear(key, out_dim, in_dim):
    kw, kb = jax.random.split(key)
    bound = 1.0 / (in_dim ** 0.5)
    w = jax.random.uniform(kw, (out_dim, in_dim), jnp.float32, -bound, bound)
    b = jax.random.uniform(kb, (out_dim,), jnp.float32, -bound, bound)
    return w, b


def _reference(x, edge_index, w_agg, b_agg, w_upd, b_upd):
    hi = jax.lax.Precision.HIGHEST
    n = x.shape[0]
    adj = jnp.zeros((n, n), jnp.float32)
    adj = adj.at[edge_index[0], edge_index[1]].set(1.0)
    adj = adj.at[edge_index[1], edge_index[0]].set(1.0)
    messages = jnp.matmul(adj, x, precision=hi)
    aggregated = jnp.matmul(messages, w_agg.T, precision=hi) + b_agg
    return jnp.matmul(x, w_upd.T, precision=hi) + b_upd + aggregated


def _run_case(key, n, d_in, d_out, e):
    k_x, k_e, k_agg, k_upd = jax.random.split(key, 4)
    x = jax.random.normal(k_x, (n, d_in), jnp.float32)
    edge_index = jax.random.randint(k_e, (2, e), 0, n, dtype=jnp.int32)
    w_upd, b_upd = _init_linear(k_upd, d_out, d_in)   # update_fn
    w_agg, b_agg = _init_linear(k_agg, d_out, d_in)   # aggregate_fn

    out = message_passing(x, edge_index, w_agg, b_agg, w_upd, b_upd)
    out = jax.block_until_ready(out)

    ref = _reference(x, edge_index, w_agg, b_agg, w_upd, b_upd)
    assert out.shape == (n, d_out)
    # Tolerance accounts for the bf16 y operand feeding the MXU (values are
    # O(1) and errors accumulate over node degree); everything else is f32.
    assert jnp.allclose(out, ref, atol=1e-1, rtol=1e-2), \
        f"mismatch vs reference at N={n}, D_in={d_in}, D_out={d_out}"


if __name__ == "__main__":
    key = jax.random.PRNGKey(0)
    k1, k2 = jax.random.split(key)

    # Small shapes matching the module's toy usage (N nodes, feature dim 32).
    _run_case(k1, n=8, d_in=32, d_out=32, e=12)
    # A larger ragged case to exercise padding + the multi-tile reduction grid.
    _run_case(k2, n=300, d_in=40, d_out=24, e=900)

    print("KERNEL_OK")
</pallas_src>

<mosaic_0001>
module attributes {stable_mosaic.version = 11 : i64} {
  func.func @linear_kernel(%arg0: i32, %arg1: memref<128x128xf32, #tpu.memory_space<vmem>>, %arg2: memref<128x256xf32, #tpu.memory_space<vmem>>, %arg3: memref<1x256xf32, #tpu.memory_space<vmem>>, %arg4: memref<128x128xbf16, #tpu.memory_space<vmem>>, %arg5: memref<128x128xf32, #tpu.memory_space<vmem>>) attributes {dimension_semantics = [#tpu.dimension_semantics<parallel>], iteration_bounds = array<i64: 2>, scalar_prefetch = 0 : i64, scratch_operands = 0 : i64, tpu.core_type = #tpu.core_type<tc>, window_params = [{transform_indices = @transform_0, window_bounds = array<i64: 128, 128>}, {pipeline_mode = #tpu.pipeline_mode<synchronous>, transform_indices = @transform_1, window_bounds = array<i64: 128, 256>}, {pipeline_mode = #tpu.pipeline_mode<synchronous>, transform_indices = @transform_2, window_bounds = array<i64: 1, 256>}, {transform_indices = @transform_3, window_bounds = array<i64: 128, 128>}, {transform_indices = @transform_4, window_bounds = array<i64: 128, 128>}]} {
    %c0 = arith.constant 0 : index
    %c0_0 = arith.constant 0 : index
    %0 = vector.load %arg1[%c0, %c0_0] : memref<128x128xf32, #tpu.memory_space<vmem>>, vector<128x128xf32>
    %c0_1 = arith.constant 0 : index
    %c0_2 = arith.constant 0 : index
    %1 = vector.load %arg2[%c0_1, %c0_2] : memref<128x256xf32, #tpu.memory_space<vmem>>, vector<128x256xf32>
    %cst = arith.constant dense<0.000000e+00> : vector<128x256xf32>
    %2 = tpu.matmul %0, %1, %cst {dimension_numbers = #tpu.dot_dimension_numbers<[1], [0], [0], [1], [0, 0, 1, 1], [], []>} : vector<128x128xf32>, vector<128x256xf32>, vector<128x256xf32> -> vector<128x256xf32>
    %c0_3 = arith.constant 0 : index
    %c0_4 = arith.constant 0 : index
    %3 = vector.load %arg3[%c0_3, %c0_4] : memref<1x256xf32, #tpu.memory_space<vmem>>, vector<1x256xf32>
    %4 = vector.broadcast %3 : vector<1x256xf32> to vector<128x256xf32>
    %5 = arith.addf %2, %4 : vector<128x256xf32>
    %6 = vector.extract_strided_slice %5 {offsets = [0, 0], sizes = [128, 128], strides = [1, 1]} : vector<128x256xf32> to vector<128x128xf32>
    %7 = arith.truncf %6 : vector<128x128xf32> to vector<128x128xbf16>
    %c0_5 = arith.constant 0 : index
    %c0_6 = arith.constant 0 : index
    %8 = vector.load %arg4[%c0_5, %c0_6] : memref<128x128xbf16, #tpu.memory_space<vmem>>, vector<128x128xbf16>
    tpu.vector_store %arg4[%c0_5, %c0_6], %7 {strides = array<i32>} : memref<128x128xbf16, #tpu.memory_space<vmem>>, vector<128x128xbf16>,
    %9 = vector.extract_strided_slice %5 {offsets = [0, 128], sizes = [128, 128], strides = [1, 1]} : vector<128x256xf32> to vector<128x128xf32>
    %c0_7 = arith.constant 0 : index
    %c0_8 = arith.constant 0 : index
    %10 = vector.load %arg5[%c0_7, %c0_8] : memref<128x128xf32, #tpu.memory_space<vmem>>, vector<128x128xf32>
    tpu.vector_store %arg5[%c0_7, %c0_8], %9 {strides = array<i32>} : memref<128x128xf32, #tpu.memory_space<vmem>>, vector<128x128xf32>,
    return
  }
  func.func @transform_0(%arg0: i32) -> (i32, i32) {
    %c0_i32 = arith.constant 0 : i32
    %c0_i32_0 = arith.constant 0 : i32
    return %arg0, %c0_i32 : i32, i32
  }
  func.func @transform_1(%arg0: i32) -> (i32, i32) {
    %c0_i32 = arith.constant 0 : i32
    %c0_i32_0 = arith.constant 0 : i32
    %c0_i32_1 = arith.constant 0 : i32
    return %c0_i32, %c0_i32_0 : i32, i32
  }
  func.func @transform_2(%arg0: i32) -> (i32, i32) {
    %c0_i32 = arith.constant 0 : i32
    %c0_i32_0 = arith.constant 0 : i32
    %c0_i32_1 = arith.constant 0 : i32
    return %c0_i32, %c0_i32_0 : i32, i32
  }
  func.func @transform_3(%arg0: i32) -> (i32, i32) {
    %c0_i32 = arith.constant 0 : i32
    %c0_i32_0 = arith.constant 0 : i32
    return %arg0, %c0_i32 : i32, i32
  }
  func.func @transform_4(%arg0: i32) -> (i32, i32) {
    %c0_i32 = arith.constant 0 : i32
    %c0_i32_0 = arith.constant 0 : i32
    return %arg0, %c0_i32 : i32, i32
  }
}

</mosaic_0001>

<bundles_post_ra>
// kernel: tpu_custom_call.1
= control target key start
LH: loop header
LB: loop body
LE: loop exit
PB: predicated region body
PF: predicated region fallthrough
CT: control target
= control target key end

     0   :  { %10 = vsyncpa [#allocation3], 0  ;;  %s1474_s0 = inlined_call_operand.hbm [shape: f32[256,128], index: 0, kind: input, shape index: {}]   ;;  %s1475_s1 = inlined_call_operand.hbm [shape: f32[128,256], index: 1, kind: input, shape index: {}]   ;;  %s1476_s2 = inlined_call_operand.vmem [shape: f32[1,256], index: 2, kind: input, shape index: {}]   ;;  %s1477_s3 = inlined_call_operand.hbm [shape: bf16[256,128], index: 3, kind: output, shape index: {0}]   ;;  %s1478_s4 = inlined_call_operand.hbm [shape: f32[256,128], index: 4, kind: output, shape index: {1}]  }
   0x1   :  { %12 = vsyncpa [#allocation3 + $0x1], 0 }
   0x2   :  { %13 = vsyncpa [#allocation6], 0 }
   0x3   :  { %14 = vsyncpa [#allocation4], 0 }
   0x4   :  { %16 = vsyncpa [#allocation4 + $0x1], 0 }
   0x5   :  { %17 = vsyncpa [#allocation9], 0 }
   0x6   :  { %19 = vsyncpa [#allocation9 + $0x1], 0  ;;  %s1133_s15 = smov 0   ;;  %s1135_s16 = smov 0  }
   0x7   :  { %s1137_s17 = smov 0   ;;  %s1139_s18 = smov 0  }
   0x8 LB: > { %s1154_s19 = sadd.s32 4294967295, %s1093_s18   ;;  %s712_s20 = sadd.s32 4294967294, %s1093_s18   ;;  %s1093_s18 = sphi %s1139_s18, %s1498_s18   ;;  %s1089_s17 = sphi %s1137_s17, %s1497_s17   ;;  %s1085_s16 = sphi %s1135_s16, %s1496_s16   ;;  %s1081_s15 = sphi %s1133_s15, %s1495_s15  }
   0x9   : > { %p45_p0 = scmp.ne.s32.totalorder %s1085_s16, %s1081_s15  ;;  %p1479_p1 = scmp.eq.s32.totalorder %s1154_s19, 0 }
   0xa   : > { %p117_p3 = scmp.eq.s32.totalorder %s712_s20, 1  ;;  %p713_p5 = scmp.ge.s32.totalorder %s1093_s18, 1 }
   0xb   : > { %p1163_p4 = por %p1479_p1, %p45_p0  ;;  %p150_p7 = scmp.lt.s32.totalorder %s1093_s18, 3 }
   0xc   : > { %p1168_p6 = por %p117_p3, %p45_p0  ;;  %s1095_s24 = smov [#allocation5]  }
   0xd   : > { %s1482_s21 = scalar_select %p1163_p4, 1, 0 }
   0xe   : > { %s1483_s22 = scalar_select %p1168_p6, 1, 0 }
   0xf   : > { %p1173_p8 = pnand %p713_p5, %p150_p7  ;;  %s162_s25 = sshll.u32 %s1095_s24, 4  ;;  %s1177_s25 = int_to_ptr.vmem [resolvable:$true] %s162_s25 }
  0x10   : > { %s1189_s27 = sadd.s32 1, %s1093_s18   ;;  %s32_s28 = sadd.s32 1, %s1089_s17 }
  0x11   : > { %s1484_s23 = scalar_select %p1173_p8, 1, 0 }
  0x12   : > { %p872_p9 = pneg %p1173_p8  ;;  %s29_s29 = ssub.s32 %s1093_s18, %s1189_s27 }
  0x13   : > { %s933_s6 = scalar_lea.hbm %s1475_s1, 4096 }
  0x14   : > { %p1184_p11 = pnand %p872_p9, %p1479_p1  ;;  %p934_p12 = scmp.ne.s32.totalorder %s1475_s1, %s933_s6 }
  0x15   : > { %p940_p5 = scmp.lt.u32.totalorder %s933_s6, %s1475_s1 }
  0x16   : > { %p935_p13 = pneg %p1184_p11 }
  0x18   : > { %p936_p0 = pnand %p935_p13, %p934_p12 }
  0x1a   : > { %p937_p3 = pneg %p936_p0 }
  0x1c   : > { %p942_p7 = pnand %p940_p5, %p937_p3 }
  0x1e   : > { %945 = shalt.err (!%p942_p7)
}
  0x1f   : > { %s946_s11 = scalar_lea.vmem %s1177_s25, 4096  ;;  %p954_p2 = scmp.lt.s32.totalorder %s1177_s25, %s1177_s25 }
  0x20   : > { %p947_p9 = scmp.ne.s32.totalorder %s1177_s25, %s946_s11  ;;  %p955_p6 = scmp.lt.s32.totalorder %s946_s11, %s946_s11 }
  0x22   : > { %p949_p10 = pnand %p947_p9, %p935_p13  ;;  %p956_p4 = por %p955_p6, %p954_p2 }
  0x24   : > { %p950_p1 = pneg %p949_p10 }
  0x26   : > { %p957_p8 = pnand %p956_p4, %p950_p1 }
  0x28   : > { %960 = shalt.err (!%p957_p8)
}
  0x29   : > { %s1096_s12 = smov 256   ;;  %s1097_s13 = smov 16  }
  0x2a   : > { %875 = dma.hbm_to_vmem [thread:$0]  (!%p1184_p11), %s1475_s1, 4096, %s1177_s25, [#allocation6], %s1096_s12, %s1096_s12, %s1097_s13  }
  0x2b   : > { %p30_p2 = scmp.eq.s32.totalorder %s29_s29, 0  ;;  %p39_p1 = scmp.ne.s32.totalorder %s1089_s17, %s1085_s16 }
  0x2c   : > { %p40_p4 = scmp.eq.s32.totalorder %s1093_s18, 0  ;;  %p888_p6 = scmp.lt.s32.totalorder %s1093_s18, 2 }
  0x2d   : > { %s1220_s24 = scalar_select %p30_p2, %s1089_s17, %s32_s28  }
  0x2e   : > { %p41_p8 = por %p40_p4, %p39_p1  ;;  %p1486_p10 = scmp.eq.s32.totalorder %s1154_s19, 1 }
  0x2f   : > { %s179_s5 = sand.u32 1, %s1089_s17   ;;  %s748_s6 = sshll.u32 %s1093_s18, 11 }
  0x30   : > { %p1224_p12 = por %p1486_p10, %p39_p1  ;;  %s716_s7 = sshll.u32 %s179_s5, 7 }
  0x31   : > { %s1233_s9 = scalar_lea.hbm %s1474_s0, %s748_s6  ;;  %s183_s25 = scalar_lea.vmem [#allocation2], %s716_s7 }
  0x32   : > { %s190_s28 = sshll.u32 %s183_s25, 4  ;;  %p1235_p11 = pnand %p888_p6, %p41_p8  ;;  %s1239_s28 = int_to_ptr.vmem [resolvable:$true] %s190_s28 }
  0x33   : > { %s1241_s10 = scalar_lea.sflag [#allocation3], %s179_s5  ;;  %s961_s11 = scalar_lea.hbm %s1233_s9, 2048 }
  0x34   : > { %p962_p13 = scmp.ne.s32.totalorder %s1233_s9, %s961_s11  ;;  %p963_p0 = pneg %p1235_p11 }
  0x35   : > { %s966_s14 = scalar_lea.hbm %s1474_s0, 4096  ;;  %p967_p7 = scmp.lt.u32.totalorder %s1233_s9, %s1474_s0 }
  0x36   : > { %p964_p3 = pnand %p963_p0, %p962_p13  ;;  %p968_p9 = scmp.lt.u32.totalorder %s966_s14, %s961_s11 }
  0x37   : > { %p970_p1 = scmp.lt.u32.totalorder %s961_s11, %s1233_s9 }
  0x38   : > { %p965_p5 = pneg %p964_p3  ;;  %p969_p2 = por %p968_p9, %p967_p7 }
  0x3a   : > { %p971_p4 = por %p970_p1, %p969_p2 }
  0x3c   : > { %p972_p6 = pnand %p971_p4, %p965_p5 }
  0x3e   : > { %975 = shalt.err (!%p972_p6)
}
  0x3f   : > { %s976_s5 = scalar_lea.vmem %s1239_s28, 2048  ;;  %s1098_s7 = smov [#allocation2]  }
  0x40   : > { %p977_p8 = scmp.ne.s32.totalorder %s1239_s28, %s976_s5  ;;  %s981_s26 = sshll.u32 %s1098_s7, 4  ;;  %s982_s26 = int_to_ptr.vmem [resolvable:$false] %s981_s26 }
  0x41   : > { %s983_s8 = scalar_lea.vmem %s982_s26, 4096  ;;  %p984_p3 = scmp.lt.s32.totalorder %s1239_s28, %s982_s26 }
  0x42   : > { %p979_p10 = pnand %p977_p8, %p963_p0  ;;  %p985_p7 = scmp.lt.s32.totalorder %s983_s8, %s976_s5 }
  0x44   : > { %p980_p13 = pneg %p979_p10  ;;  %p986_p9 = por %p985_p7, %p984_p3 }
  0x46   : > { %p987_p2 = pnand %p986_p9, %p980_p13 }
  0x48   : > { %990 = shalt.err (!%p987_p2)
}
  0x49   : > { %s1099_s25 = smov 128   ;;  %s1100_s11 = smov 8  }
  0x4a   : > { %879 = dma.hbm_to_vmem [thread:$0]  (!%p1235_p11), %s1233_s9, 2048, %s1239_s28, %s1241_s10, %s1099_s25, %s1099_s25, %s1100_s11  }
  0x4b   : > { %p1489_p0 = scmp.ne.s32.totalorder %s1484_s23, 0 }
  0x4c   : > { %s1272_s12 = sand.u32 (!%p1489_p0), 1, %s1085_s16   ;;  %p1490_p5 = scmp.ne.s32.totalorder (!%p1489_p0), %s1482_s21, 0 }
  0x4d   : > { %202 = sbr.rel (%p1489_p0) target bundleno = 406 (0x196), region = 32  ;;  %s720_s13 = sshll.u32 (!%p1489_p0), %s1272_s12, 7 }
  0x4e   : > { %s205_s14 = scalar_lea.sflag (!%p1489_p0), [#allocation3], %s1272_s12  ;;  %s1278_s20 = scalar_lea.vmem (!%p1489_p0), [#allocation2], %s720_s13 }
  0x54   : > { %1064 = dma.done.wait (%p1490_p5), %s205_s14, 2048  }
  0x55   : > { %1066 = vsyncadd (%p1490_p5), %s205_s14, 4294965248  ;;  %p1491_p11 = scmp.eq.s32.totalorder %s1154_s19, 0 }
  0x57   : > { %1068 = dma.done.wait (%p1491_p11), [#allocation6], 4096   ;;  %p1492_p1 = pmov %p1491_p11 }
  0x58   : > { %v1101_v0 = vmov 0.0   ;;  %v262_v1 = vld [vmem:[#allocation5 + $0x8] sm:$0xff]  ;;  %v264_v2 = vld [vmem:[#allocation5 + $0x18] sm:$0xff]  ;;  %v261_v3 = vld [vmem:[#allocation5] sm:$0xff]  ;;  %s722_s9 = sshll.u32 %s1272_s12, 6  ;;  %s1332_s28 = scalar_lea.vmem [#allocation8], %s720_s13 }
  0x59   : > { %1070 = vsyncadd (%p1492_p1), [#allocation6], 4294963200  ;;  %369 = vmatprep.mubr.f32.mxu0 %v1101_v0  ;;  %417 = vmatprep.mubr.f32.mxu1 %v1101_v0  ;;  %v814_v4 = vpack.c.bf16 %v264_v2, %v262_v1  ;;  %v263_v5 = vld [vmem:[#allocation5 + $0x10] sm:$0xff]  ;;  %v266_v6 = vld [vmem:[#allocation5 + $0x28] sm:$0xff]  ;;  %v295_v2 = vlaneseq  ;;  %s1344_s29 = scalar_lea.vmem [#allocation7], %s722_s9  ;;  %s765_s6 = sshll.u32 %s1154_s19, 10 }
  0x5a   : > { %v268_v7 = vld [vmem:[#allocation5 + $0x38] sm:$0xff]  ;;  %v816_v8 = vpack.c.bf16 %v263_v5, %v261_v3  ;;  %v265_v10 = vld [vmem:[#allocation5 + $0x20] sm:$0xff]  ;;  %v267_v11 = vld [vmem:[#allocation5 + $0x30] sm:$0xff]  ;;  %s581_s10 = sshll.u32 %s1344_s29, 4  ;;  %s766_s5 = sshll.u32 %s1154_s19, 11  ;;  %s1378_s10 = int_to_ptr.vmem [resolvable:$true] %s581_s10 }
  0x5b   : > { %v818_v9 = vpack.c.bf16 %v268_v7, %v266_v6  ;;  %v270_v12 = vld [vmem:[#allocation5 + $0x48] sm:$0xff]  ;;  %815 = vmatprep.subr.bf16.mxu0 %v814_v4  ;;  %846 = vmatprep.subr.bf16.mxu1 %v814_v4  ;;  %v272_v13 = vld [vmem:[#allocation5 + $0x58] sm:$0xff]  ;;  %v820_v14 = vpack.c.bf16 %v267_v11, %v265_v10  ;;  %v269_v16 = vld [vmem:[#allocation5 + $0x40] sm:$0xff]  ;;  %v296_v3 = vshrl.u32 %v295_v2, 7  ;;  %s597_s7 = sshll.u32 %s1332_s28, 4  ;;  %s1389_s25 = scalar_lea.hbm %s1477_s3, %s765_s6  ;;  %s1402_s7 = int_to_ptr.vmem [resolvable:$true] %s597_s7 }
  0x5c   : > { %817 = vmatpush1.bf16.msra.mxu0 %v816_v8  ;;  %854 = vmatpush1.bf16.msra.mxu1 %v816_v8  ;;  %v822_v15 = vpack.c.bf16 %v272_v13, %v270_v12  ;;  %v271_v17 = vld [vmem:[#allocation5 + $0x50] sm:$0xff]  ;;  %v274_v18 = vld [vmem:[#allocation5 + $0x68] sm:$0xff]  ;;  %v276_v19 = vld [vmem:[#allocation5 + $0x78] sm:$0xff]  ;;  %s1398_s13 = scalar_lea.hbm %s1478_s4, %s766_s5  ;;  %s568_s14 = scalar_lea.sflag [#allocation9], %s1272_s12 }
  0x5d   : > { %819 = vmatprep.subr.bf16.mxu0 %v818_v9  ;;  %847 = vmatprep.subr.bf16.mxu1 %v818_v9  ;;  %v824_v20 = vpack.c.bf16 %v271_v17, %v269_v16  ;;  %v826_v21 = vpack.c.bf16 %v276_v19, %v274_v18  ;;  %v273_v22 = vld [vmem:[#allocation5 + $0x60] sm:$0xff]  ;;  %v275_v23 = vld [vmem:[#allocation5 + $0x70] sm:$0xff]  ;;  %v278_v24 = vld [vmem:[#allocation5 + $0x88] sm:$0xff]  ;;  %v301_v4 = vsub.s32 1, %v296_v3  ;;  %v297_v6 = vsub.s32 0, %v296_v3  ;;  %s1102_s21 = smov [#allocation8]  }
  0x5e   : > { %v280_v25 = vld [vmem:[#allocation5 + $0x98] sm:$0xff]  ;;  %v828_v26 = vpack.c.bf16 %v275_v23, %v273_v22  ;;  %v277_v28 = vld [vmem:[#allocation5 + $0x80] sm:$0xff]  ;;  %v279_v29 = vld [vmem:[#allocation5 + $0x90] sm:$0xff]  ;;  %s995_s23 = sshll.u32 %s1102_s21, 4  ;;  %s996_s23 = int_to_ptr.vmem [resolvable:$false] %s995_s23 }
  0x5f   : > { %v830_v27 = vpack.c.bf16 %v280_v25, %v278_v24  ;;  %v282_v30 = vld [vmem:[#allocation5 + $0xa8] sm:$0xff]  ;;  %v284_v31 = vld [vmem:[#allocation5 + $0xb8] sm:$0xff]  ;;  %v832_v32 = vpack.c.bf16 %v279_v29, %v277_v28  ;;  %v281_v34 = vld [vmem:[#allocation5 + $0xa0] sm:$0xff]  ;;  %s997_s9 = scalar_lea.vmem %s996_s23, 4096  ;;  %p998_p10 = scmp.lt.s32.totalorder %s1402_s7, %s996_s23 }
  0x60   : > { %821 = vmatpush1.bf16.msra.mxu0 %v820_v14  ;;  %855 = vmatpush1.bf16.msra.mxu1 %v820_v14  ;;  %v834_v33 = vpack.c.bf16 %v284_v31, %v282_v30  ;;  %v283_v35 = vld [vmem:[#allocation5 + $0xb0] sm:$0xff]  ;;  %v286_v36 = vld [vmem:[#allocation5 + $0xc8] sm:$0xff]  ;;  %v288_v37 = vld [vmem:[#allocation5 + $0xd8] sm:$0xff] }
  0x61   : > { %823 = vmatprep.subr.bf16.mxu0 %v822_v15  ;;  %848 = vmatprep.subr.bf16.mxu1 %v822_v15  ;;  %v836_v38 = vpack.c.bf16 %v283_v35, %v281_v34  ;;  %v838_v39 = vpack.c.bf16 %v288_v37, %v286_v36  ;;  %v285_v40 = vld [vmem:[#allocation5 + $0xc0] sm:$0xff]  ;;  %v287_v41 = vld [vmem:[#allocation5 + $0xd0] sm:$0xff]  ;;  %v290_v42 = vld [vmem:[#allocation5 + $0xe8] sm:$0xff] }
  0x62   : > { %v292_v43 = vld [vmem:[#allocation5 + $0xf8] sm:$0xff]  ;;  %v840_v44 = vpack.c.bf16 %v287_v41, %v285_v40  ;;  %v289_v46 = vld [vmem:[#allocation5 + $0xe0] sm:$0xff]  ;;  %v291_v47 = vld [vmem:[#allocation5 + $0xf0] sm:$0xff] }
  0x63   : > { %v842_v45 = vpack.c.bf16 %v292_v43, %v290_v42  ;;  %v844_v48 = vpack.c.bf16 %v291_v47, %v289_v46  ;;  %v245_v49 = vld [vmem:[%s1278_s20] sm:$0xff]  ;;  %v246_v51 = vld [vmem:[%s1278_s20 + $0x8] sm:$0xff]  ;;  %v247_v53 = vld [vmem:[%s1278_s20 + $0x10] sm:$0xff] }
  0x64   : > { %825 = vmatpush1.bf16.msra.mxu0 %v824_v20  ;;  %856 = vmatpush1.bf16.msra.mxu1 %v824_v20  ;;  %v253_v50 = vld [vmem:[%s1278_s20 + $0x40] sm:$0xff]  ;;  %v254_v52 = vld [vmem:[%s1278_s20 + $0x48] sm:$0xff]  ;;  %v255_v54 = vld [vmem:[%s1278_s20 + $0x50] sm:$0xff] }
  0x65   : > { %827 = vmatprep.subr.bf16.mxu0 %v826_v21  ;;  %849 = vmatprep.subr.bf16.mxu1 %v826_v21  ;;  %v248_v55 = vld [vmem:[%s1278_s20 + $0x18] sm:$0xff]  ;;  %v249_v57 = vld [vmem:[%s1278_s20 + $0x20] sm:$0xff]  ;;  %v250_v59 = vld [vmem:[%s1278_s20 + $0x28] sm:$0xff] }
  0x66   : > { %v256_v56 = vld [vmem:[%s1278_s20 + $0x58] sm:$0xff]  ;;  %v257_v58 = vld [vmem:[%s1278_s20 + $0x60] sm:$0xff]  ;;  %v258_v60 = vld [vmem:[%s1278_s20 + $0x68] sm:$0xff] }
  0x67   : > { %v251_v61 = vld [vmem:[%s1278_s20 + $0x30] sm:$0xff]  ;;  %v252_v63 = vld [vmem:[%s1278_s20 + $0x38] sm:$0xff]  ;;  %v293_v5 = vld [vmem:[%s1476_s2] sm:$0x3] }
  0x68   : > { %829 = vmatpush1.bf16.msra.mxu0 %v828_v26  ;;  %857 = vmatpush1.bf16.msra.mxu1 %v828_v26  ;;  %v259_v62 = vld [vmem:[%s1278_s20 + $0x70] sm:$0xff]  ;;  %v260_v1 = vld [vmem:[%s1278_s20 + $0x78] sm:$0xff]  ;;  %v1323_v7 = vrot.slane %v293_v5, %v301_v4  ;;  %v1325_v10 = vrot.slane %v293_v5, %v297_v6  ;;  %s991_s20 = scalar_lea.vmem %s1402_s7, 2048 }
  0x69   : > { %831 = vmatprep.subr.bf16.mxu0 %v830_v27  ;;  %850 = vmatprep.subr.bf16.mxu1 %v830_v27  ;;  %p992_p4 = scmp.ne.s32.totalorder %s1402_s7, %s991_s20  ;;  %p999_p13 = scmp.lt.s32.totalorder %s997_s9, %s991_s20 }
  0x6b   : > { %p993_p6 = pnand %p992_p4, %p1224_p12  ;;  %p1000_p3 = por %p999_p13, %p998_p10 }
  0x6c   : > { %833 = vmatpush1.bf16.msra.mxu0 %v832_v32  ;;  %858 = vmatpush1.bf16.msra.mxu1 %v832_v32 }
  0x6d   : > { %835 = vmatprep.subr.bf16.mxu0 %v834_v33  ;;  %851 = vmatprep.subr.bf16.mxu1 %v834_v33  ;;  %p994_p8 = pneg %p993_p6 }
  0x6f   : > { %p1001_p7 = pnand %p1000_p3, %p994_p8 }
  0x70   : > { %837 = vmatpush1.bf16.msra.mxu0 %v836_v38  ;;  %859 = vmatpush1.bf16.msra.mxu1 %v836_v38 }
  0x71   : > { %839 = vmatprep.subr.bf16.mxu0 %v838_v39  ;;  %852 = vmatprep.subr.bf16.mxu1 %v838_v39 }
  0x74   : > { %841 = vmatpush1.bf16.msra.mxu0 %v840_v44  ;;  %860 = vmatpush1.bf16.msra.mxu1 %v840_v44 }
  0x75   : > { %843 = vmatprep.subr.bf16.mxu0 %v842_v45  ;;  %853 = vmatprep.subr.bf16.mxu1 %v842_v45 }
  0x78   : > { %845 = vmatpush1.bf16.msra.mxu0 %v844_v48  ;;  %861 = vmatpush1.bf16.msra.mxu1 %v844_v48 }
  0x7b   : > { %370 = vmatmul.mubr.f32.vlgmr.msra.gmra.mrb[0].mxu0 %v245_v49  ;;  %418 = vmatmul.mubr.f32.vlgmr.msra.gmra.mrb[0].mxu1 %v253_v50 }
  0x7c   : > { %375 = vmatprep.mubr.f32.mxu0 %v1101_v0  ;;  %423 = vmatprep.mubr.f32.mxu1 %v1101_v0 }
  0x7f   : > { %376 = vmatmul.mubr.f32.gmra.mrb[2].mxu0 %v246_v51  ;;  %424 = vmatmul.mubr.f32.gmra.mrb[2].mxu1 %v254_v52 }
  0x80   : > { %381 = vmatprep.mubr.f32.mxu0 %v1101_v0  ;;  %429 = vmatprep.mubr.f32.mxu1 %v1101_v0 }
  0x83   : > { %382 = vmatmul.mubr.f32.gmra.mrb[4].mxu0 %v247_v53  ;;  %430 = vmatmul.mubr.f32.gmra.mrb[4].mxu1 %v255_v54 }
  0x84   : > { %387 = vmatprep.mubr.f32.mxu0 %v1101_v0  ;;  %435 = vmatprep.mubr.f32.mxu1 %v1101_v0 }
  0x87   : > { %388 = vmatmul.mubr.f32.gmra.mrb[6].mxu0 %v248_v55  ;;  %436 = vmatmul.mubr.f32.gmra.mrb[6].mxu1 %v256_v56 }
  0x88   : > { %393 = vmatprep.mubr.f32.mxu0 %v1101_v0  ;;  %441 = vmatprep.mubr.f32.mxu1 %v1101_v0 }
  0x8b   : > { %394 = vmatmul.mubr.f32.gmra.mrb[8].mxu0 %v249_v57  ;;  %442 = vmatmul.mubr.f32.gmra.mrb[8].mxu1 %v257_v58 }
  0x8c   : > { %399 = vmatprep.mubr.f32.mxu0 %v1101_v0  ;;  %447 = vmatprep.mubr.f32.mxu1 %v1101_v0 }
  0x8f   : > { %400 = vmatmul.mubr.f32.gmra.mrb[10].mxu0 %v250_v59  ;;  %448 = vmatmul.mubr.f32.gmra.mrb[10].mxu1 %v258_v60 }
  0x90   : > { %405 = vmatprep.mubr.f32.mxu0 %v1101_v0  ;;  %453 = vmatprep.mubr.f32.mxu1 %v1101_v0 }
  0x93   : > { %406 = vmatmul.mubr.f32.gmra.mrb[12].mxu0 %v251_v61  ;;  %454 = vmatmul.mubr.f32.gmra.mrb[12].mxu1 %v259_v62 }
  0x94   : > { %411 = vmatprep.mubr.f32.mxu0 %v1101_v0  ;;  %459 = vmatprep.mubr.f32.mxu1 %v1101_v0 }
  0x97   : > { %412 = vmatmul.mubr.f32.gmra.mrb[14].mxu0 %v252_v63  ;;  %460 = vmatmul.mubr.f32.gmra.mrb[14].mxu1 %v260_v1 }
 0x14e   : > { %v371_v8 = vpop.f32.mrb[0].mxu0  ;;  %v419_v9 = vpop.f32.mrb[0].mxu1 }
 0x14f   : > { %v373_v0 = vpop.f32.mrb[1].mxu0  ;;  %v421_v11 = vpop.f32.mrb[1].mxu1  ;;  %v372_v16 = vadd.f32 %v371_v8, %v1325_v10  ;;  %v420_v17 = vadd.f32 %v419_v9, %v1325_v10 }
 0x150   : > { %v374_v12 = vadd.f32 %v373_v0, %v1323_v7  ;;  %v422_v13 = vadd.f32 %v421_v11, %v1323_v7 }
 0x152   : > { %546 = vst [vmem:[%s1332_s28] sm:$0xff] %v374_v12  ;;  %554 = vst [vmem:[%s1332_s28 + $0x40] sm:$0xff] %v422_v13  ;;  %v377_v14 = vpop.f32.mrb[2].mxu0  ;;  %v425_v15 = vpop.f32.mrb[2].mxu1 }
 0x153   : > { %v378_v18 = vadd.f32 %v377_v14, %v1325_v10  ;;  %v426_v19 = vadd.f32 %v425_v15, %v1325_v10  ;;  %v379_v20 = vpop.f32.mrb[3].mxu0  ;;  %v427_v21 = vpop.f32.mrb[3].mxu1 }
 0x154   : > { %v380_v22 = vadd.f32 %v379_v20, %v1323_v7  ;;  %v428_v23 = vadd.f32 %v427_v21, %v1323_v7 }
 0x155   : > { %v770_v24 = vpack.c.bf16 %v378_v18, %v372_v16  ;;  %v790_v25 = vpack.c.bf16 %v426_v19, %v420_v17 }
 0x156   : > { %547 = vst [vmem:[%s1332_s28 + $0x8] sm:$0xff] %v380_v22  ;;  %555 = vst [vmem:[%s1332_s28 + $0x48] sm:$0xff] %v428_v23  ;;  %v383_v26 = vpop.f32.mrb[4].mxu0  ;;  %v431_v27 = vpop.f32.mrb[4].mxu1 }
 0x157   : > { %771 = vst [vmem:[%s1344_s29] sm:$0xff] %v770_v24   ;;  %810 = vst [vmem:[%s1344_s29 + $0x20] sm:$0xff] %v790_v25   ;;  %v385_v28 = vpop.f32.mrb[5].mxu0  ;;  %v433_v29 = vpop.f32.mrb[5].mxu1  ;;  %v384_v34 = vadd.f32 %v383_v26, %v1325_v10  ;;  %v432_v35 = vadd.f32 %v431_v27, %v1325_v10 }
 0x158   : > { %v386_v30 = vadd.f32 %v385_v28, %v1323_v7  ;;  %v434_v31 = vadd.f32 %v433_v29, %v1323_v7 }
 0x15a   : > { %548 = vst [vmem:[%s1332_s28 + $0x10] sm:$0xff] %v386_v30  ;;  %556 = vst [vmem:[%s1332_s28 + $0x50] sm:$0xff] %v434_v31  ;;  %v389_v32 = vpop.f32.mrb[6].mxu0  ;;  %v437_v33 = vpop.f32.mrb[6].mxu1 }
 0x15b   : > { %v390_v36 = vadd.f32 %v389_v32, %v1325_v10  ;;  %v438_v37 = vadd.f32 %v437_v33, %v1325_v10  ;;  %v391_v38 = vpop.f32.mrb[7].mxu0  ;;  %v439_v39 = vpop.f32.mrb[7].mxu1 }
 0x15c   : > { %v392_v40 = vadd.f32 %v391_v38, %v1323_v7  ;;  %v440_v41 = vadd.f32 %v439_v39, %v1323_v7 }
 0x15d   : > { %v775_v42 = vpack.c.bf16 %v390_v36, %v384_v34  ;;  %v795_v43 = vpack.c.bf16 %v438_v37, %v432_v35 }
 0x15e   : > { %549 = vst [vmem:[%s1332_s28 + $0x18] sm:$0xff] %v392_v40  ;;  %557 = vst [vmem:[%s1332_s28 + $0x58] sm:$0xff] %v440_v41  ;;  %v395_v44 = vpop.f32.mrb[8].mxu0  ;;  %v443_v45 = vpop.f32.mrb[8].mxu1 }
 0x15f   : > { %807 = vst [vmem:[%s1344_s29 + $0x8] sm:$0xff] %v775_v42   ;;  %811 = vst [vmem:[%s1344_s29 + $0x28] sm:$0xff] %v795_v43   ;;  %v397_v46 = vpop.f32.mrb[9].mxu0  ;;  %v445_v47 = vpop.f32.mrb[9].mxu1  ;;  %v396_v52 = vadd.f32 %v395_v44, %v1325_v10  ;;  %v444_v53 = vadd.f32 %v443_v45, %v1325_v10 }
 0x160   : > { %v398_v48 = vadd.f32 %v397_v46, %v1323_v7  ;;  %v446_v49 = vadd.f32 %v445_v47, %v1323_v7 }
 0x162   : > { %550 = vst [vmem:[%s1332_s28 + $0x20] sm:$0xff] %v398_v48  ;;  %558 = vst [vmem:[%s1332_s28 + $0x60] sm:$0xff] %v446_v49  ;;  %v401_v50 = vpop.f32.mrb[10].mxu0  ;;  %v449_v51 = vpop.f32.mrb[10].mxu1 }
 0x163   : > { %v402_v54 = vadd.f32 %v401_v50, %v1325_v10  ;;  %v450_v55 = vadd.f32 %v449_v51, %v1325_v10  ;;  %v403_v56 = vpop.f32.mrb[11].mxu0  ;;  %v451_v57 = vpop.f32.mrb[11].mxu1 }
 0x164   : > { %v404_v58 = vadd.f32 %v403_v56, %v1323_v7  ;;  %v452_v59 = vadd.f32 %v451_v57, %v1323_v7 }
 0x165   : > { %v780_v60 = vpack.c.bf16 %v402_v54, %v396_v52  ;;  %v800_v61 = vpack.c.bf16 %v450_v55, %v444_v53 }
 0x166   : > { %551 = vst [vmem:[%s1332_s28 + $0x28] sm:$0xff] %v404_v58  ;;  %559 = vst [vmem:[%s1332_s28 + $0x68] sm:$0xff] %v452_v59  ;;  %v407_v62 = vpop.f32.mrb[12].mxu0  ;;  %v455_v63 = vpop.f32.mrb[12].mxu1 }
 0x167   : > { %808 = vst [vmem:[%s1344_s29 + $0x10] sm:$0xff] %v780_v60   ;;  %812 = vst [vmem:[%s1344_s29 + $0x30] sm:$0xff] %v800_v61   ;;  %v409_v1 = vpop.f32.mrb[13].mxu0  ;;  %v457_v2 = vpop.f32.mrb[13].mxu1  ;;  %v408_v8 = vadd.f32 %v407_v62, %v1325_v10  ;;  %v456_v9 = vadd.f32 %v455_v63, %v1325_v10 }
 0x168   : > { %v410_v3 = vadd.f32 %v409_v1, %v1323_v7  ;;  %v458_v4 = vadd.f32 %v457_v2, %v1323_v7 }
 0x16a   : > { %552 = vst [vmem:[%s1332_s28 + $0x30] sm:$0xff] %v410_v3  ;;  %560 = vst [vmem:[%s1332_s28 + $0x70] sm:$0xff] %v458_v4  ;;  %v413_v5 = vpop.f32.mrb[14].mxu0  ;;  %v461_v6 = vpop.f32.mrb[14].mxu1 }
 0x16b   : > { %v414_v0 = vadd.f32 %v413_v5, %v1325_v10  ;;  %v462_v11 = vadd.f32 %v461_v6, %v1325_v10  ;;  %v415_v12 = vpop.f32.mrb[15].mxu0  ;;  %v463_v13 = vpop.f32.mrb[15].mxu1 }
 0x16c   : > { %v416_v14 = vadd.f32 %v415_v12, %v1323_v7  ;;  %v464_v15 = vadd.f32 %v463_v13, %v1323_v7 }
 0x16d   : > { %v785_v16 = vpack.c.bf16 %v414_v0, %v408_v8  ;;  %v805_v17 = vpack.c.bf16 %v462_v11, %v456_v9 }
 0x16e   : > { %553 = vst [vmem:[%s1332_s28 + $0x38] sm:$0xff] %v416_v14  ;;  %561 = vst [vmem:[%s1332_s28 + $0x78] sm:$0xff] %v464_v15 }
 0x16f   : > { %809 = vst [vmem:[%s1344_s29 + $0x18] sm:$0xff] %v785_v16   ;;  %813 = vst [vmem:[%s1344_s29 + $0x38] sm:$0xff] %v805_v17  }
 0x170   : > { %1004 = shalt.err (!%p1001_p7)
}
 0x171   : > { %s1005_s28 = scalar_lea.hbm %s1398_s13, 2048  ;;  %s1009_s5 = scalar_lea.hbm %s1478_s4, 4096 }
 0x172   : > { %p1006_p9 = scmp.ne.s32.totalorder %s1398_s13, %s1005_s28  ;;  %p1010_p5 = scmp.lt.u32.totalorder %s1398_s13, %s1478_s4 }
 0x173   : > { %p1011_p11 = scmp.lt.u32.totalorder %s1009_s5, %s1005_s28  ;;  %p1013_p4 = scmp.lt.u32.totalorder %s1005_s28, %s1398_s13 }
 0x174   : > { %p1007_p2 = pnand %p1006_p9, %p1224_p12 }
 0x175   : > { %p1012_p1 = por %p1011_p11, %p1010_p5 }
 0x176   : > { %p1008_p0 = pneg %p1007_p2 }
 0x177   : > { %p1014_p6 = por %p1013_p4, %p1012_p1 }
 0x179   : > { %p1015_p8 = pnand %p1014_p6, %p1008_p0 }
 0x17b   : > { %1018 = shalt.err (!%p1015_p8)
}
 0x17c   : > { %s1103_s19 = smov 128   ;;  %s1104_s11 = smov 8  }
 0x17d   : > { %869 = dma.vmem_to_hbm [thread:$0]  (%p1224_p12), %s1402_s7, 2048, %s1398_s13, %s568_s14, %s1103_s19, %s1103_s19, %s1104_s11  }
 0x17e   : > { %s563_s20 = scalar_lea.sflag [#allocation4], %s1272_s12  ;;  %s1019_s21 = scalar_lea.vmem %s1378_s10, 1024 }
 0x17f   : > { %p1020_p10 = scmp.ne.s32.totalorder %s1378_s10, %s1019_s21  ;;  %s1105_s23 = smov [#allocation7]  }
 0x180   : > { %s1023_s9 = sshll.u32 %s1105_s23, 4  ;;  %s1024_s9 = int_to_ptr.vmem [resolvable:$false] %s1023_s9 }
 0x181   : > { %p1021_p13 = pnand %p1020_p10, %p1224_p12  ;;  %s1025_s28 = scalar_lea.vmem %s1024_s9, 2048 }
 0x182   : > { %p1026_p7 = scmp.lt.s32.totalorder %s1378_s10, %s1024_s9  ;;  %p1027_p9 = scmp.lt.s32.totalorder %s1025_s28, %s1019_s21 }
 0x183   : > { %p1022_p3 = pneg %p1021_p13 }
 0x184   : > { %p1028_p2 = por %p1027_p9, %p1026_p7 }
 0x186   : > { %p1029_p0 = pnand %p1028_p2, %p1022_p3 }
 0x188   : > { %1032 = shalt.err (!%p1029_p0)
}
 0x189   : > { %s1033_s7 = scalar_lea.hbm %s1389_s25, 1024  ;;  %s1037_s29 = scalar_lea.hbm %s1477_s3, 2048 }
 0x18a   : > { %p1034_p5 = scmp.ne.s32.totalorder %s1389_s25, %s1033_s7  ;;  %p1038_p4 = scmp.lt.u32.totalorder %s1389_s25, %s1477_s3 }
 0x18b   : > { %p1039_p6 = scmp.lt.u32.totalorder %s1037_s29, %s1033_s7  ;;  %p1041_p10 = scmp.lt.u32.totalorder %s1033_s7, %s1389_s25 }
 0x18c   : > { %p1035_p11 = pnand %p1034_p5, %p1224_p12 }
 0x18d   : > { %p1040_p8 = por %p1039_p6, %p1038_p4 }
 0x18e   : > { %p1036_p1 = pneg %p1035_p11 }
 0x18f   : > { %p1042_p13 = por %p1041_p10, %p1040_p8 }
 0x191   : > { %p1043_p3 = pnand %p1042_p13, %p1036_p1 }
 0x193   : > { %1046 = shalt.err (!%p1043_p3)
}
 0x194   : > { %s1106_s26 = smov 64   ;;  %s1107_s8 = smov 4  }
 0x195   : > { %868 = dma.vmem_to_hbm [thread:$0]  (%p1224_p12), %s1378_s10, 1024, %s1389_s25, %s563_s20, %s1106_s26, %s1106_s26, %s1107_s8  }
 0x196 PF: > { %s612_s19 = sand.u32 1, %s1081_s15   ;;  %p1493_p7 = scmp.ne.s32.totalorder %s1483_s22, 0 }
 0x197   : > { %p1494_p9 = scmp.ge.s32.totalorder %s1093_s18, 2  ;;  %s613_s11 = scalar_lea.sflag [#allocation4], %s612_s19 }
 0x199   : > { %p881_p2 = pnand %p1494_p9, %p1493_p7 }
 0x19b   : > { %1072 = dma.done.wait (!%p881_p2), %s613_s11, 1024  }
 0x19c   : > { %1074 = vsyncadd (!%p881_p2), %s613_s11, 4294966272  ;;  %s622_s21 = scalar_lea.sflag [#allocation9], %s612_s19 }
 0x19d   : > { %1076 = dma.done.wait (!%p881_p2), %s622_s21, 2048  }
 0x19e   : > { %1078 = vsyncadd (!%p881_p2), %s622_s21, 4294965248  ;;  %p22_p12 = scmp.ge.s32.totalorder %s1189_s27, 4   ;;  %s1495_s15 = smov %s1085_s16 }
 0x19f   : > { %s1496_s16 = smov %s1089_s17  ;;  %s1497_s17 = smov %s1220_s24 }
 0x1a0   : > { %s1498_s18 = smov %s1189_s27  ;;  %24 = sbr.rel (!%p22_p12) target bundleno = 8 (0x8), region = 98 }
 0x1a7   :  { %627 = vsyncpa [#allocation3], 1 }
 0x1a8   :  { %629 = vsyncpa [#allocation3 + $0x1], 1 }
 0x1a9   :  { %630 = vsyncpa [#allocation6], 1 }
 0x1aa   :  { %631 = vsyncpa [#allocation4], 1 }
 0x1ab   :  { %633 = vsyncpa [#allocation4 + $0x1], 1 }
 0x1ac   :  { %634 = vsyncpa [#allocation9], 1 }
 0x1ad   :  { %636 = vsyncpa [#allocation9 + $0x1], 1 }

</bundles_post_ra>
